<compile_context>
chip_gen: v7x
topology: tpu7x:2x2x1
jax: 0.10.0
libtpu: 0.0.40
codegen_flags: <defaults>
</compile_context>

<pallas_src>
import jax
import jax.numpy as jnp
from jax.experimental import pallas as pl
from jax.experimental.pallas import tpu as pltpu

# ----------------------------- problem sizes --------------------------------
B = 2                               # batch of clips per call
T, H, W, C = 8, 16, 16, 3           # video: 8 frames of 16x16 RGB
CROP = 8                            # stand-in for CenterCrop(88) at small scale
SAMPLES_PER_FRAME = 640             # 16 kHz audio @ 25 fps
N_AUDIO = T * SAMPLES_PER_FRAME     # 5120 samples per clip
AUDIO_CH = 2                        # stereo input waveform
D_MODEL = 32                        # fusion hidden size
VOCAB = 128                         # stand-in vocabulary size


# -------------------- single fused kernel (one clip per grid step) ----------
def _fused_kernel(wav_ref, vid_ref, wa_ref, wv_ref, wo_ref, tok_ref):
    # wav_ref: (1, AUDIO_CH, T, 640) f32   vid_ref: (1, C, T, CROP*CROP) f32
    # wa_ref: (640, D)  wv_ref: (64, D)  wo_ref: (D, VOCAB)
    # tok_ref: (1, T, 1) int32

    # ---- audio: channel mean + whole-utterance layer-norm, shaped (T, 640) ----
    wav = wav_ref[0].astype(jnp.float32)                 # (AUDIO_CH, T, 640)
    mono = jnp.mean(wav, axis=0)                         # (T, 640) == mean(dim=0)
    n_samp = float(T * SAMPLES_PER_FRAME)
    s1 = jnp.sum(mono)                                   # single pass: E[x], E[x^2]
    s2 = jnp.sum(mono * mono)
    mu = s1 / n_samp
    var = s2 / n_samp - mu * mu
    audio_feats = (mono - mu) * jax.lax.rsqrt(var + 1e-5)   # (T, 640)

    # ---- video: /255 -> grayscale -> Normalize(0.421, 0.165) ----------------
    # (CenterCrop + THWC->TCHW permute are pure index glue done in the wrapper.)
    vid = vid_ref[0].astype(jnp.float32) / 255.0          # (C, T, 64)
    gray = 0.2989 * vid[0] + 0.587 * vid[1] + 0.114 * vid[2]   # (T, 64)
    video_feats = (gray - 0.421) / 0.165                  # (T, 64)

    # ---- synthetic fusion head on the MXU ------------------------------------
    a = jnp.dot(audio_feats, wa_ref[...], preferred_element_type=jnp.float32)
    v = jnp.dot(video_feats, wv_ref[...], preferred_element_type=jnp.float32)
    fused = jnp.tanh(a + v)                                # (T, D)
    logits = jnp.dot(fused, wo_ref[...], preferred_element_type=jnp.float32)  # (T, VOCAB)

    # ---- argmax over vocab (lane axis) inside the kernel ---------------------
    col = jax.lax.broadcasted_iota(jnp.int32, logits.shape, 1).astype(jnp.float32)
    maxv = jnp.max(logits, axis=-1, keepdims=True)
    cand = jnp.where(logits == maxv, col, jnp.float32(VOCAB))
    tok = jnp.min(cand, axis=-1, keepdims=True).astype(jnp.int32)   # (T, 1), first max
    tok_ref[...] = tok[None, :, :]                         # (1, T, 1)


# ---------------------------- full forward pass ------------------------------
def inference_pipeline_forward(waveform, video, w_a, w_v, w_o):
    b, c_a, n = waveform.shape
    assert video.shape == (b, T, H, W, C)

    # ---- rate-ratio check (static shapes, mirrors the PyTorch assert) ----
    rate_ratio = n // T
    assert 530 < rate_ratio < 670, "The video frame rate should be between 24 and 30 fps."
    # rate_ratio == 640 here, so cut_or_pad is a no-op (matches the `pass` branch).

    # Audio as (B, AUDIO_CH, T, 640): contiguous free reshape, lane-dense (640 = 5*128).
    wav = waveform.reshape(b, c_a, T, SAMPLES_PER_FRAME)

    # CenterCrop (index glue) + permute((0,3,1,2)) with spatial dims flattened,
    # channel leading so the kernel indexes channels on an untiled axis.
    ch = (H - CROP) // 2
    cw = (W - CROP) // 2
    vid = video[:, :, ch:ch + CROP, cw:cw + CROP, :]              # (B, T, 8, 8, C)
    vid = jnp.transpose(vid, (0, 4, 1, 2, 3)).reshape(b, C, T, CROP * CROP)

    tokens = pl.pallas_call(
        _fused_kernel,
        out_shape=jax.ShapeDtypeStruct((b, T, 1), jnp.int32),
        grid=(b,),
        in_specs=[
            pl.BlockSpec((1, c_a, T, SAMPLES_PER_FRAME), lambda i: (i, 0, 0, 0)),
            pl.BlockSpec((1, C, T, CROP * CROP), lambda i: (i, 0, 0, 0)),
            pl.BlockSpec((SAMPLES_PER_FRAME, D_MODEL), lambda i: (0, 0)),   # resident
            pl.BlockSpec((CROP * CROP, D_MODEL), lambda i: (0, 0)),         # resident
            pl.BlockSpec((D_MODEL, VOCAB), lambda i: (0, 0)),               # resident
        ],
        out_specs=pl.BlockSpec((1, T, 1), lambda i: (i, 0, 0)),
        compiler_params=pltpu.CompilerParams(
            dimension_semantics=("parallel",)),   # clips shard across v7x's 2 TCs
    )(wav, vid, w_a, w_v, w_o)

    return tokens[..., 0]                                   # (B, T) token ids


if __name__ == "__main__":
    key = jax.random.PRNGKey(0)
    k1, k2, k3, k4, k5 = jax.random.split(key, 5)

    # torchvision.io.read_video -> THWC uint8-range pixels (batched clips)
    video = jax.random.uniform(k1, (B, T, H, W, C), jnp.float32, 0.0, 255.0)
    # torchaudio.load(normalize=True) -> (channels, samples), 16 kHz (batched clips)
    waveform = 0.1 * jax.random.normal(k2, (B, AUDIO_CH, N_AUDIO), jnp.float32)

    # deterministic synthetic parameters for the stand-in fusion head
    w_a = 0.05 * jax.random.normal(k3, (SAMPLES_PER_FRAME, D_MODEL), jnp.float32)
    w_v = 0.05 * jax.random.normal(k4, (CROP * CROP, D_MODEL), jnp.float32)
    w_o = 0.05 * jax.random.normal(k5, (D_MODEL, VOCAB), jnp.float32)

    transcript = inference_pipeline_forward(waveform, video, w_a, w_v, w_o)
    transcript = jax.block_until_ready(transcript)
    assert transcript.shape == (B, T)
    assert transcript.dtype == jnp.int32
    print("KERNEL_OK")
</pallas_src>

<mosaic_0001>
module attributes {stable_mosaic.version = 11 : i64} {
  func.func @_fused_kernel(%arg0: i32, %arg1: memref<1x2x8x640xf32, #tpu.memory_space<vmem>>, %arg2: memref<1x3x8x64xf32, #tpu.memory_space<vmem>>, %arg3: memref<640x32xf32, #tpu.memory_space<vmem>>, %arg4: memref<64x32xf32, #tpu.memory_space<vmem>>, %arg5: memref<32x128xf32, #tpu.memory_space<vmem>>, %arg6: memref<1x8x1xi32, #tpu.memory_space<vmem>>) attributes {dimension_semantics = [#tpu.dimension_semantics<parallel>], iteration_bounds = array<i64: 2>, scalar_prefetch = 0 : i64, scratch_operands = 0 : i64, tpu.core_type = #tpu.core_type<tc>, window_params = [{transform_indices = @transform_0, window_bounds = array<i64: 1, 2, 8, 640>}, {transform_indices = @transform_1, window_bounds = array<i64: 1, 3, 8, 64>}, {pipeline_mode = #tpu.pipeline_mode<synchronous>, transform_indices = @transform_2, window_bounds = array<i64: 640, 32>}, {pipeline_mode = #tpu.pipeline_mode<synchronous>, transform_indices = @transform_3, window_bounds = array<i64: 64, 32>}, {pipeline_mode = #tpu.pipeline_mode<synchronous>, transform_indices = @transform_4, window_bounds = array<i64: 32, 128>}, {transform_indices = @transform_5, window_bounds = array<i64: 1, 8, 1>}]} {
    %c0 = arith.constant 0 : index
    %c0_0 = arith.constant 0 : index
    %c0_1 = arith.constant 0 : index
    %c0_2 = arith.constant 0 : index
    %0 = vector.load %arg1[%c0, %c0_0, %c0_1, %c0_2] : memref<1x2x8x640xf32, #tpu.memory_space<vmem>>, vector<1x2x8x640xf32>
    %1 = vector.shape_cast %0 : vector<1x2x8x640xf32> to vector<2x8x640xf32>
    %cst = arith.constant dense<0.000000e+00> : vector<8x640xf32>
    %2 = vector.multi_reduction <add>, %1, %cst [0] : vector<2x8x640xf32> to vector<8x640xf32>
    %cst_3 = arith.constant 2.000000e+00 : f32
    %3 = vector.broadcast %cst_3 : f32 to vector<8x640xf32>
    %4 = arith.divf %2, %3 : vector<8x640xf32>
    %5 = vector.shape_cast %4 : vector<8x640xf32> to vector<1x8x640xf32>
    %cst_4 = arith.constant dense<0.000000e+00> : vector<1xf32>
    %6 = vector.multi_reduction <add>, %5, %cst_4 [1, 2] : vector<1x8x640xf32> to vector<1xf32>
    %7 = vector.shape_cast %6 : vector<1xf32> to vector<1x1x1xf32>
    %8 = vector.extract %7[0, 0, 0] : f32 from vector<1x1x1xf32>
    %9 = arith.mulf %4, %4 : vector<8x640xf32>
    %10 = vector.shape_cast %9 : vector<8x640xf32> to vector<1x8x640xf32>
    %cst_5 = arith.constant dense<0.000000e+00> : vector<1xf32>
    %11 = vector.multi_reduction <add>, %10, %cst_5 [1, 2] : vector<1x8x640xf32> to vector<1xf32>
    %12 = vector.shape_cast %11 : vector<1xf32> to vector<1x1x1xf32>
    %13 = vector.extract %12[0, 0, 0] : f32 from vector<1x1x1xf32>
    %cst_6 = arith.constant 5.120000e+03 : f32
    %14 = arith.divf %8, %cst_6 : f32
    %cst_7 = arith.constant 5.120000e+03 : f32
    %15 = arith.divf %13, %cst_7 : f32
    %16 = arith.mulf %14, %14 : f32
    %17 = arith.subf %15, %16 : f32
    %18 = vector.broadcast %14 : f32 to vector<8x640xf32>
    %19 = arith.subf %4, %18 : vector<8x640xf32>
    %cst_8 = arith.constant 9.99999974E-6 : f32
    %20 = arith.addf %17, %cst_8 : f32
    %21 = math.rsqrt %20 : f32
    %22 = vector.broadcast %21 : f32 to vector<8x640xf32>
    %23 = arith.mulf %19, %22 : vector<8x640xf32>
    %c0_9 = arith.constant 0 : index
    %c0_10 = arith.constant 0 : index
    %c0_11 = arith.constant 0 : index
    %c0_12 = arith.constant 0 : index
    %24 = vector.load %arg2[%c0_9, %c0_10, %c0_11, %c0_12] : memref<1x3x8x64xf32, #tpu.memory_space<vmem>>, vector<1x3x8x64xf32>
    %25 = vector.shape_cast %24 : vector<1x3x8x64xf32> to vector<3x8x64xf32>
    %cst_13 = arith.constant 2.550000e+02 : f32
    %26 = vector.broadcast %cst_13 : f32 to vector<3x8x64xf32>
    %27 = arith.divf %25, %26 : vector<3x8x64xf32>
    %28 = vector.extract_strided_slice %27 {offsets = [0, 0, 0], sizes = [1, 8, 64], strides = [1, 1, 1]} : vector<3x8x64xf32> to vector<1x8x64xf32>
    %29 = vector.shape_cast %28 : vector<1x8x64xf32> to vector<8x64xf32>
    %cst_14 = arith.constant 2.989000e-01 : f32
    %30 = vector.broadcast %cst_14 : f32 to vector<8x64xf32>
    %31 = arith.mulf %30, %29 : vector<8x64xf32>
    %32 = vector.extract_strided_slice %27 {offsets = [1, 0, 0], sizes = [1, 8, 64], strides = [1, 1, 1]} : vector<3x8x64xf32> to vector<1x8x64xf32>
    %33 = vector.shape_cast %32 : vector<1x8x64xf32> to vector<8x64xf32>
    %cst_15 = arith.constant 5.870000e-01 : f32
    %34 = vector.broadcast %cst_15 : f32 to vector<8x64xf32>
    %35 = arith.mulf %34, %33 : vector<8x64xf32>
    %36 = arith.addf %31, %35 : vector<8x64xf32>
    %37 = vector.extract_strided_slice %27 {offsets = [2, 0, 0], sizes = [1, 8, 64], strides = [1, 1, 1]} : vector<3x8x64xf32> to vector<1x8x64xf32>
    %38 = vector.shape_cast %37 : vector<1x8x64xf32> to vector<8x64xf32>
    %cst_16 = arith.constant 1.140000e-01 : f32
    %39 = vector.broadcast %cst_16 : f32 to vector<8x64xf32>
    %40 = arith.mulf %39, %38 : vector<8x64xf32>
    %41 = arith.addf %36, %40 : vector<8x64xf32>
    %cst_17 = arith.constant 4.210000e-01 : f32
    %42 = vector.broadcast %cst_17 : f32 to vector<8x64xf32>
    %43 = arith.subf %41, %42 : vector<8x64xf32>
    %cst_18 = arith.constant 1.650000e-01 : f32
    %44 = vector.broadcast %cst_18 : f32 to vector<8x64xf32>
    %45 = arith.divf %43, %44 : vector<8x64xf32>
    %c0_19 = arith.constant 0 : index
    %c0_20 = arith.constant 0 : index
    %46 = vector.load %arg3[%c0_19, %c0_20] : memref<640x32xf32, #tpu.memory_space<vmem>>, vector<640x32xf32>
    %cst_21 = arith.constant dense<0.000000e+00> : vector<8x32xf32>
    %47 = tpu.matmul %23, %46, %cst_21 {dimension_numbers = #tpu.dot_dimension_numbers<[1], [0], [0], [1], [0, 0, 1, 1], [], []>} : vector<8x640xf32>, vector<640x32xf32>, vector<8x32xf32> -> vector<8x32xf32>
    %c0_22 = arith.constant 0 : index
    %c0_23 = arith.constant 0 : index
    %48 = vector.load %arg4[%c0_22, %c0_23] : memref<64x32xf32, #tpu.memory_space<vmem>>, vector<64x32xf32>
    %cst_24 = arith.constant dense<0.000000e+00> : vector<8x32xf32>
    %49 = tpu.matmul %45, %48, %cst_24 {dimension_numbers = #tpu.dot_dimension_numbers<[1], [0], [0], [1], [0, 0, 1, 1], [], []>} : vector<8x64xf32>, vector<64x32xf32>, vector<8x32xf32> -> vector<8x32xf32>
    %50 = arith.addf %47, %49 : vector<8x32xf32>
    %51 = math.tanh %50 : vector<8x32xf32>
    %c0_25 = arith.constant 0 : index
    %c0_26 = arith.constant 0 : index
    %52 = vector.load %arg5[%c0_25, %c0_26] : memref<32x128xf32, #tpu.memory_space<vmem>>, vector<32x128xf32>
    %cst_27 = arith.constant dense<0.000000e+00> : vector<8x128xf32>
    %53 = tpu.matmul %51, %52, %cst_27 {dimension_numbers = #tpu.dot_dimension_numbers<[1], [0], [0], [1], [0, 0, 1, 1], [], []>} : vector<8x32xf32>, vector<32x128xf32>, vector<8x128xf32> -> vector<8x128xf32>
    %54 = tpu.iota {dimensions = array<i32: 1>} : vector<8x128xi32>
    %55 = arith.sitofp %54 : vector<8x128xi32> to vector<8x128xf32>
    %cst_28 = arith.constant dense<0xFF800000> : vector<8xf32>
    %56 = vector.multi_reduction <maximumf>, %53, %cst_28 [1] : vector<8x128xf32> to vector<8xf32>
    %57 = vector.shape_cast %56 : vector<8xf32> to vector<8x1xf32>
    %58 = vector.broadcast %57 : vector<8x1xf32> to vector<8x128xf32>
    %59 = arith.cmpf oeq, %53, %58 : vector<8x128xf32>
    %cst_29 = arith.constant 1.280000e+02 : f32
    %60 = vector.broadcast %cst_29 : f32 to vector<8x128xf32>
    %61 = arith.select %59, %55, %60 : vector<8x128xi1>, vector<8x128xf32>
    %cst_30 = arith.constant dense<0x7F800000> : vector<8xf32>
    %62 = vector.multi_reduction <minimumf>, %61, %cst_30 [1] : vector<8x128xf32> to vector<8xf32>
    %63 = vector.shape_cast %62 : vector<8xf32> to vector<8x1xf32>
    %64 = arith.fptosi %63 : vector<8x1xf32> to vector<8x1xi32>
    %65 = vector.shape_cast %64 : vector<8x1xi32> to vector<1x8x1xi32>
    %c0_31 = arith.constant 0 : index
    %c0_32 = arith.constant 0 : index
    %c0_33 = arith.constant 0 : index
    %66 = vector.load %arg6[%c0_31, %c0_32, %c0_33] : memref<1x8x1xi32, #tpu.memory_space<vmem>>, vector<1x8x1xi32>
    tpu.vector_store %arg6[%c0_31, %c0_32, %c0_33], %65 {strides = array<i32>} : memref<1x8x1xi32, #tpu.memory_space<vmem>>, vector<1x8x1xi32>,
    return
  }
  func.func @transform_0(%arg0: i32) -> (i32, i32, i32, i32) {
    %c0_i32 = arith.constant 0 : i32
    %c0_i32_0 = arith.constant 0 : i32
    %c0_i32_1 = arith.constant 0 : i32
    %c0_i32_2 = arith.constant 0 : i32
    return %arg0, %c0_i32, %c0_i32_0, %c0_i32_1 : i32, i32, i32, i32
  }
  func.func @transform_1(%arg0: i32) -> (i32, i32, i32, i32) {
    %c0_i32 = arith.constant 0 : i32
    %c0_i32_0 = arith.constant 0 : i32
    %c0_i32_1 = arith.constant 0 : i32
    %c0_i32_2 = arith.constant 0 : i32
    return %arg0, %c0_i32, %c0_i32_0, %c0_i32_1 : i32, i32, i32, i32
  }
  func.func @transform_2(%arg0: i32) -> (i32, i32) {
    %c0_i32 = arith.constant 0 : i32
    %c0_i32_0 = arith.constant 0 : i32
    %c0_i32_1 = arith.constant 0 : i32
    return %c0_i32, %c0_i32_0 : i32, i32
  }
  func.func @transform_3(%arg0: i32) -> (i32, i32) {
    %c0_i32 = arith.constant 0 : i32
    %c0_i32_0 = arith.constant 0 : i32
    %c0_i32_1 = arith.constant 0 : i32
    return %c0_i32, %c0_i32_0 : i32, i32
  }
  func.func @transform_4(%arg0: i32) -> (i32, i32) {
    %c0_i32 = arith.constant 0 : i32
    %c0_i32_0 = arith.constant 0 : i32
    %c0_i32_1 = arith.constant 0 : i32
    return %c0_i32, %c0_i32_0 : i32, i32
  }
  func.func @transform_5(%arg0: i32) -> (i32, i32, i32) {
    %c0_i32 = arith.constant 0 : i32
    %c0_i32_0 = arith.constant 0 : i32
    %c0_i32_1 = arith.constant 0 : i32
    return %arg0, %c0_i32, %c0_i32_0 : i32, i32, i32
  }
}

</mosaic_0001>

<bundles_post_ra>
// kernel: tpu_custom_call.1
= control target key start
LH: loop header
LB: loop body
LE: loop exit
PB: predicated region body
PF: predicated region fallthrough
CT: control target
= control target key end

     0   :  { %s1216_s18 = smov 0   ;;  %s1568_s0 = inlined_call_operand.vmem [shape: f32[2,2,8,640], index: 0, kind: input, shape index: {}]   ;;  %s1569_s1 = inlined_call_operand.vmem [shape: f32[2,3,8,64], index: 1, kind: input, shape index: {}]   ;;  %s1570_s2 = inlined_call_operand.vmem [shape: f32[640,32], index: 2, kind: input, shape index: {}]   ;;  %s1571_s3 = inlined_call_operand.vmem [shape: f32[64,32], index: 3, kind: input, shape index: {}]   ;;  %s1572_s4 = inlined_call_operand.vmem [shape: f32[32,128], index: 4, kind: input, shape index: {}]   ;;  %s1573_s5 = inlined_call_operand.vmem [shape: s32[2,8,1], index: 5, kind: output, shape index: {}]  }
   0x1 LB: > { %s862_s19 = sadd.s32 4294967295, %s1181_s18   ;;  %p866_p0 = scmp.ge.s32.totalorder %s1181_s18, 1  ;;  %s1181_s18 = sphi %s1216_s18, %s15_s18  }
   0x2   : > { %p197_p1 = scmp.lt.s32.totalorder %s1181_s18, 3 }
   0x4   : > { %p198_p2 = pnand %p866_p0, %p197_p1 }
   0x5   : > { %p229_p3 = scmp.lt.s32.totalorder (!%p198_p2), %s862_s19, 1  ;;  %v414_v33 = vld [vmem:[%s1571_s3] sm:$0xff] (!%p198_p2)  ;;  %v415_v34 = vld [vmem:[%s1571_s3 + $0x8] sm:$0xff] (!%p198_p2)  ;;  %v416_v35 = vld [vmem:[%s1571_s3 + $0x10] sm:$0xff] (!%p198_p2)  ;;  %v1183_v36 = vmov (!%p198_p2), 0.0|0.0   ;;  %vm1184_vm0 = vmmov (!%p198_p2), 0  }
   0x6   : > { %201 = sbr.rel (%p198_p2) target bundleno = 1072 (0x430), region = 40  ;;  %1041 = vmatprep.subr.bf16.mxu1 (!%p198_p2), %v1183_v36  ;;  %v1042_v37 = vpack.c.bf16 (!%p198_p2), %v415_v34, %v414_v33  ;;  %v417_v38 = vld [vmem:[%s1571_s3 + $0x18] sm:$0xff] (!%p198_p2)  ;;  %v1185_v39 = vmov (!%p198_p2), 0.0   ;;  %v382_v40 = vld [vmem:[%s1570_s2 + $0x180] sm:$0xff] (!%p198_p2)  ;;  %v419_v43 = vld [vmem:[%s1571_s3 + $0x28] sm:$0xff] (!%p198_p2)  ;;  %vm422_vm1 = vcmask (!%p198_p2), 523264  }
   0x7   : > { %992 = vmatprep.mubr.msk.f32.mxu1 (!%p198_p2), %vm1184_vm0, %v1185_v39  ;;  %v1045_v41 = vpack.c.bf16 (!%p198_p2), %v417_v38, %v416_v35  ;;  %v418_v42 = vld [vmem:[%s1571_s3 + $0x20] sm:$0xff] (!%p198_p2)  ;;  %v383_v44 = vld [vmem:[%s1570_s2 + $0x188] sm:$0xff] (!%p198_p2)  ;;  %v384_v55 = vld [vmem:[%s1570_s2 + $0x190] sm:$0xff] (!%p198_p2)  ;;  %vm711_vm2 = vcmask (!%p198_p2), 261120   ;;  %vm795_vm4 = vcmask (!%p198_p2), 7168  }
   0x8   : > { %1043 = vmatpush3.bf16.msra.mxu1 (!%p198_p2), %v1042_v37  ;;  %v1085_v45 = vpack.c.bf16 (!%p198_p2), %v383_v44, %v382_v40  ;;  %v366_v46 = vld [vmem:[%s1570_s2 + $0x100] sm:$0xff] (!%p198_p2)  ;;  %v367_v47 = vld [vmem:[%s1570_s2 + $0x108] sm:$0xff] (!%p198_p2)  ;;  %v1048_v56 = vpack.c.bf16 (!%p198_p2), %v419_v43, %v418_v42  ;;  %v420_v57 = vld [vmem:[%s1571_s3 + $0x30] sm:$0xff] (!%p198_p2) }
   0x9   : > { %1044 = vmatprep.subr.bf16.mxu1 (!%p198_p2), %v1183_v36  ;;  %v1087_v49 = vpack.c.bf16 (!%p198_p2), %v367_v47, %v366_v46  ;;  %v421_v58 = vld [vmem:[%s1571_s3 + $0x38] sm:$0xff] (!%p198_p2)  ;;  %v390_v33 = vld [vmem:[%s1570_s2 + $0x1c0] sm:$0xff] (!%p198_p2)  ;;  %v391_v34 = vld [vmem:[%s1570_s2 + $0x1c8] sm:$0xff] (!%p198_p2) }
   0xa   : > { %1086 = vmatprep.subr.bf16.mxu0 (!%p198_p2), %v1085_v45  ;;  %v385_v60 = vld [vmem:[%s1570_s2 + $0x198] sm:$0xff] (!%p198_p2)  ;;  %v1101_v40 = vpack.c.bf16 (!%p198_p2), %v391_v34, %v390_v33  ;;  %v375_v42 = vld [vmem:[%s1570_s2 + $0x148] sm:$0xff] (!%p198_p2)  ;;  %v354_v43 = vld [vmem:[%s1570_s2 + $0xa0] sm:$0xff] (!%p198_p2) }
   0xb   : > { %1088 = vmatpush3.bf16.msra.mxu0 (!%p198_p2), %v1087_v49  ;;  %v1089_v63 = vpack.c.bf16 (!%p198_p2), %v385_v60, %v384_v55  ;;  %v337_v38 = vld [vmem:[%s1570_s2 + $0x18] sm:$0xff] (!%p198_p2)  ;;  %v355_v44 = vld [vmem:[%s1570_s2 + $0xa8] sm:$0xff] (!%p198_p2)  ;;  %v392_v45 = vld [vmem:[%s1570_s2 + $0x1d0] sm:$0xff] (!%p198_p2) }
   0xc   : > { %1046 = vmatpush3.bf16.msra.mxu1 (!%p198_p2), %v1045_v41  ;;  %v374_v41 = vld [vmem:[%s1570_s2 + $0x140] sm:$0xff] (!%p198_p2)  ;;  %v393_v46 = vld [vmem:[%s1570_s2 + $0x1d8] sm:$0xff] (!%p198_p2)  ;;  %v339_v49 = vld [vmem:[%s1570_s2 + $0x28] sm:$0xff] (!%p198_p2) }
   0xd   : > { %s1575_s19 = smov (!%p229_p3, %s862_s19), 1  ;;  %1047 = vmatprep.subr.bf16.mxu1 %v1183_v36  ;;  %1090 = vmatprep.subr.bf16.mxu0 %v1089_v63  ;;  %v377_v55 = vld [vmem:[%s1570_s2 + $0x158] sm:$0xff]  ;;  %v340_v60 = vld [vmem:[%s1570_s2 + $0x30] sm:$0xff] }
   0xe   : > { %s1150_s20 = smul.u32 80, %s1575_s19  ;;  %v341_v63 = vld [vmem:[%s1570_s2 + $0x38] sm:$0xff] }
   0xf   : > { %s1151_s7 = smul.u32 24, %s1575_s19 }
  0x10   : > { %s233_s23 = scalar_lea.vmem %s1568_s0, %s1150_s20  ;;  %1049 = vmatpush3.bf16.msra.mxu1 %v1048_v56  ;;  %v357_v56 = vld [vmem:[%s1570_s2 + $0xb8] sm:$0xff] }
  0x11   : > { %v243_v0 = vld [vmem:[%s233_s23] sm:$0xff]  ;;  %v244_v1 = vld [vmem:[%s233_s23 + $0x8] sm:$0xff]  ;;  %v245_v2 = vld [vmem:[%s233_s23 + $0x10] sm:$0xff]  ;;  %s238_s20 = scalar_lea.vmem %s1569_s1, %s1151_s7  ;;  %1050 = vmatprep.subr.bf16.mxu1 %v1183_v36 }
  0x12   : > { %v246_v3 = vld [vmem:[%s233_s23 + $0x18] sm:$0xff]  ;;  %v247_v4 = vld [vmem:[%s233_s23 + $0x20] sm:$0xff]  ;;  %v248_v5 = vld [vmem:[%s233_s23 + $0x28] sm:$0xff] }
  0x13   : > { %v249_v6 = vld [vmem:[%s233_s23 + $0x30] sm:$0xff]  ;;  %v250_v7 = vld [vmem:[%s233_s23 + $0x38] sm:$0xff]  ;;  %v251_v8 = vld [vmem:[%s233_s23 + $0x40] sm:$0xff]  ;;  %v253_v9 = vadd.f32 %v248_v5, %v243_v0 }
  0x14   : > { %v252_v10 = vld [vmem:[%s233_s23 + $0x48] sm:$0xff]  ;;  %v254_v11 = vadd.f32 %v249_v6, %v244_v1  ;;  %v255_v12 = vadd.f32 %v250_v7, %v245_v2  ;;  %v256_v13 = vadd.f32 %v251_v8, %v246_v3  ;;  %v319_v48 = vld [vmem:[%s238_s20] sm:$0xff]  ;;  %v321_v51 = vld [vmem:[%s238_s20 + $0x10] sm:$0xff]  ;;  %v1051_v8 = vpack.c.bf16 %v421_v58, %v420_v57 }
  0x15   : > { %v1230_v14 = vmul.f32 0.5, %v253_v9  ;;  %v257_v15 = vadd.f32 %v252_v10, %v247_v4  ;;  %v320_v50 = vld [vmem:[%s238_s20 + $0x8] sm:$0xff]  ;;  %v323_v52 = vmul.f32 0.003921569, %v319_v48  ;;  %v325_v54 = vmul.f32 0.003921569, %v321_v51 }
  0x16   : > { %v1232_v16 = vmul.f32 0.5, %v254_v11  ;;  %v1234_v17 = vmul.f32 0.5, %v255_v12  ;;  %v1238_v19 = vmul.f32 0.5, %v256_v13  ;;  %v324_v53 = vmul.f32 0.003921569, %v320_v50  ;;  %v368_v0 = vld [vmem:[%s1570_s2 + $0x110] sm:$0xff]  ;;  %1052 = vmatpush3.bf16.msra.mxu1 %v1051_v8 }
  0x17   : > { %v277_v18 = vmul.f32 %v1230_v14, %v1230_v14  ;;  %v1246_v23 = vmul.f32 0.5, %v257_v15  ;;  %v326_v59 = vmul.f32 0.2989, %v323_v52  ;;  %v329_v62 = vmul.f32 0.114, %v325_v54  ;;  %v369_v1 = vld [vmem:[%s1570_s2 + $0x118] sm:$0xff] }
  0x18   : > { %v264_v20 = vadd.f32 %v1232_v16, %v1230_v14  ;;  %v278_v21 = vmul.f32 %v1232_v16, %v1232_v16  ;;  %v279_v22 = vmul.f32 %v1234_v17, %v1234_v17  ;;  %v280_v25 = vmul.f32 %v1238_v19, %v1238_v19  ;;  %v350_v2 = vld [vmem:[%s1570_s2 + $0x80] sm:$0xff]  ;;  %v351_v3 = vld [vmem:[%s1570_s2 + $0x88] sm:$0xff]  ;;  %v356_v52 = vld [vmem:[%s1570_s2 + $0xb0] sm:$0xff] }
  0x19   : > { %v281_v28 = vmul.f32 %v1246_v23, %v1246_v23  ;;  %v327_v61 = vmul.f32 0.587, %v324_v53  ;;  %v1091_v4 = vpack.c.bf16 %v369_v1, %v368_v0  ;;  %v386_v5 = vld [vmem:[%s1570_s2 + $0x1a0] sm:$0xff]  ;;  %v387_v7 = vld [vmem:[%s1570_s2 + $0x1a8] sm:$0xff]  ;;  %v1053_v13 = vpack.c.bf16 %v351_v3, %v350_v2  ;;  %v376_v54 = vld [vmem:[%s1570_s2 + $0x150] sm:$0xff] }
  0x1a   : > { %v265_v24 = vadd.f32 %v264_v20, %v1234_v17  ;;  %v282_v26 = vadd.f32 %v278_v21, %v277_v18  ;;  %v334_v9 = vld [vmem:[%s1570_s2] sm:$0xff]  ;;  %v1093_v10 = vpack.c.bf16 %v387_v7, %v386_v5  ;;  %v371_v12 = vld [vmem:[%s1570_s2 + $0x128] sm:$0xff]  ;;  %v388_v21 = vld [vmem:[%s1570_s2 + $0x1b0] sm:$0xff]  ;;  %v1103_v50 = vpack.c.bf16 %v375_v42, %v374_v41 }
  0x1b   : > { %v328_v6 = vadd.f32 %v327_v61, %v326_v59  ;;  %1092 = vmatpush3.bf16.msra.mxu0 %v1091_v4  ;;  %v370_v11 = vld [vmem:[%s1570_s2 + $0x120] sm:$0xff]  ;;  %v335_v18 = vld [vmem:[%s1570_s2 + $0x8] sm:$0xff]  ;;  %1054 = vmatprep.subr.bf16.mxu1 %v1053_v13  ;;  %v1061_v51 = vpack.c.bf16 %v355_v44, %v354_v43  ;;  %v1105_v53 = vpack.c.bf16 %v393_v46, %v392_v45  ;;  %v381_v43 = vld [vmem:[%s1570_s2 + $0x178] sm:$0xff] }
  0x1c   : > { %v266_v27 = vadd.f32 %v265_v24, %v1238_v19  ;;  %v283_v29 = vadd.f32 %v282_v26, %v279_v22  ;;  %v1095_v20 = vpack.c.bf16 %v371_v12, %v370_v11  ;;  %v389_v22 = vld [vmem:[%s1570_s2 + $0x1b8] sm:$0xff]  ;;  %v352_v24 = vld [vmem:[%s1570_s2 + $0x90] sm:$0xff]  ;;  %1094 = vmatprep.subr.bf16.mxu0 %v1093_v10  ;;  %v338_v48 = vld [vmem:[%s1570_s2 + $0x20] sm:$0xff]  ;;  %v1107_v61 = vpack.c.bf16 %v377_v55, %v376_v54 }
  0x1d   : > { %v330_v15 = vadd.f32 %v329_v62, %v328_v6  ;;  %v1097_v26 = vpack.c.bf16 %v389_v22, %v388_v21  ;;  %v394_v57 = vld [vmem:[%s1570_s2 + $0x1e0] sm:$0xff]  ;;  %v395_v58 = vld [vmem:[%s1570_s2 + $0x1e8] sm:$0xff]  ;;  %v1063_v59 = vpack.c.bf16 %v339_v49, %v338_v48  ;;  %v1065_v62 = vpack.c.bf16 %v357_v56, %v356_v52  ;;  %v360_v10 = vld [vmem:[%s1570_s2 + $0xd0] sm:$0xff] }
  0x1e   : > { %v267_v30 = vadd.f32 %v266_v27, %v1246_v23  ;;  %v284_v31 = vadd.f32 %v283_v29, %v280_v25  ;;  %v353_v25 = vld [vmem:[%s1570_s2 + $0x98] sm:$0xff]  ;;  %v372_v27 = vld [vmem:[%s1570_s2 + $0x130] sm:$0xff]  ;;  %v1109_v0 = vpack.c.bf16 %v395_v58, %v394_v57  ;;  %v378_v1 = vld [vmem:[%s1570_s2 + $0x160] sm:$0xff]  ;;  %v1067_v5 = vpack.c.bf16 %v341_v63, %v340_v60 }
  0x1f   : > { %v373_v29 = vld [vmem:[%s1570_s2 + $0x138] sm:$0xff]  ;;  %1096 = vmatpush3.bf16.msra.mxu0 %v1095_v20  ;;  %v1057_v37 = vpack.c.bf16 %v353_v25, %v352_v24  ;;  %v379_v2 = vld [vmem:[%s1570_s2 + $0x168] sm:$0xff]  ;;  %v358_v3 = vld [vmem:[%s1570_s2 + $0xc0] sm:$0xff] }
  0x20   : > { %268 = vadd.xlane.f32.xlu0 %v267_v30  ;;  %v285_v32 = vadd.f32 %v284_v31, %v281_v28  ;;  %v870_v28 = vadd.f32 -0.421, %v330_v15  ;;  %v1055_v30 = vpack.c.bf16 %v335_v18, %v334_v9  ;;  %v336_v31 = vld [vmem:[%s1570_s2 + $0x10] sm:$0xff]  ;;  %1098 = vmatprep.subr.bf16.mxu0 %v1097_v26  ;;  %v359_v4 = vld [vmem:[%s1570_s2 + $0xc8] sm:$0xff]  ;;  %v1111_v6 = vpack.c.bf16 %v379_v2, %v378_v1  ;;  %v342_v8 = vld [vmem:[%s1570_s2 + $0x40] sm:$0xff] }
  0x21   : > { %v1059_v47 = vpack.c.bf16 %v337_v38, %v336_v31  ;;  %v1069_v7 = vpack.c.bf16 %v359_v4, %v358_v3  ;;  %v343_v9 = vld [vmem:[%s1570_s2 + $0x48] sm:$0xff]  ;;  %v361_v11 = vld [vmem:[%s1570_s2 + $0xd8] sm:$0xff]  ;;  %v344_v15 = vld [vmem:[%s1570_s2 + $0x50] sm:$0xff] }
  0x22   : > { %v333_v35 = vmul.f32 6.060606, %v870_v28  ;;  %v1071_v12 = vpack.c.bf16 %v343_v9, %v342_v8  ;;  %v1073_v13 = vpack.c.bf16 %v361_v11, %v360_v10  ;;  %v345_v18 = vld [vmem:[%s1570_s2 + $0x58] sm:$0xff]  ;;  %v362_v20 = vld [vmem:[%s1570_s2 + $0xe0] sm:$0xff]  ;;  %v363_v21 = vld [vmem:[%s1570_s2 + $0xe8] sm:$0xff] }
  0x23   : > { %v1075_v22 = vpack.c.bf16 %v345_v18, %v344_v15  ;;  %v1077_v24 = vpack.c.bf16 %v363_v21, %v362_v20  ;;  %v346_v25 = vld [vmem:[%s1570_s2 + $0x60] sm:$0xff]  ;;  %v347_v26 = vld [vmem:[%s1570_s2 + $0x68] sm:$0xff]  ;;  %v396_v31 = vld [vmem:[%s1570_s2 + $0x1f0] sm:$0xff] }
  0x24   : > { %286 = vadd.xlane.f32.xlu0 %v285_v32  ;;  %v1099_v32 = vpack.c.bf16 %v373_v29, %v372_v27  ;;  %993 = vmatmul.mubr.msk.f32.vlgmr.msra.gmra.mrb[0].mxu1 %vm422_vm1, %v333_v35  ;;  %v1079_v27 = vpack.c.bf16 %v347_v26, %v346_v25  ;;  %v364_v35 = vld [vmem:[%s1570_s2 + $0xf0] sm:$0xff]  ;;  %v349_v45 = vld [vmem:[%s1570_s2 + $0x78] sm:$0xff]  ;;  %v399_v60 = vld [vmem:[%s1570_s2 + $0x208] sm:$0xff] }
  0x25   : > { %1056 = vmatpush3.bf16.msra.mxu1 %v1055_v30  ;;  %v380_v38 = vld [vmem:[%s1570_s2 + $0x170] sm:$0xff]  ;;  %v405_v10 = vld [vmem:[%s1570_s2 + $0x238] sm:$0xff]  ;;  %v410_v21 = vld [vmem:[%s1570_s2 + $0x260] sm:$0xff] }
  0x26   : > { %1100 = vmatpush3.bf16.msra.mxu0 %v1099_v32  ;;  %1058 = vmatprep.subr.bf16.mxu1 %v1057_v37  ;;  %v397_v32 = vld [vmem:[%s1570_s2 + $0x1f8] sm:$0xff]  ;;  %v348_v44 = vld [vmem:[%s1570_s2 + $0x70] sm:$0xff]  ;;  %v1115_v46 = vpack.c.bf16 %v381_v43, %v380_v38 }
  0x27   : > { %1102 = vmatprep.subr.bf16.mxu0 %v1101_v40  ;;  %v1113_v34 = vpack.c.bf16 %v397_v32, %v396_v31  ;;  %v365_v37 = vld [vmem:[%s1570_s2 + $0xf8] sm:$0xff]  ;;  %v404_v9 = vld [vmem:[%s1570_s2 + $0x230] sm:$0xff]  ;;  %v707_v32 = vld [vmem:[%s1572_s4] sm:$0xff] }
  0x28   : > { %v1081_v42 = vpack.c.bf16 %v365_v37, %v364_v35  ;;  %v1127_v11 = vpack.c.bf16 %v405_v10, %v404_v9  ;;  %v408_v15 = vld [vmem:[%s1570_s2 + $0x250] sm:$0xff]  ;;  %v409_v18 = vld [vmem:[%s1570_s2 + $0x258] sm:$0xff] }
  0x29   : > { %1060 = vmatpush3.bf16.msra.mxu1 %v1059_v47  ;;  %v1083_v47 = vpack.c.bf16 %v349_v45, %v348_v44  ;;  %v1133_v20 = vpack.c.bf16 %v409_v18, %v408_v15  ;;  %v412_v25 = vld [vmem:[%s1570_s2 + $0x270] sm:$0xff]  ;;  %v413_v26 = vld [vmem:[%s1570_s2 + $0x278] sm:$0xff] }
  0x2a   : > { %1104 = vmatpush3.bf16.msra.mxu0 %v1103_v50  ;;  %1062 = vmatprep.subr.bf16.mxu1 %v1061_v51 }
  0x2b   : > { %1106 = vmatprep.subr.bf16.mxu0 %v1105_v53 }
  0x2d   : > { %1064 = vmatpush3.bf16.msra.mxu1 %v1063_v59  ;;  %v398_v59 = vld [vmem:[%s1570_s2 + $0x200] sm:$0xff] }
  0x2e   : > { %1108 = vmatpush3.bf16.msra.mxu0 %v1107_v61  ;;  %1066 = vmatprep.subr.bf16.mxu1 %v1065_v62 }
  0x2f   : > { %1110 = vmatprep.subr.bf16.mxu0 %v1109_v0 }
  0x31   : > { %1068 = vmatpush3.bf16.msra.mxu1 %v1067_v5  ;;  %v1118_v5 = vpack.c.bf16 %v399_v60, %v398_v59 }
  0x32   : > { %1112 = vmatpush3.bf16.msra.mxu0 %v1111_v6  ;;  %1070 = vmatprep.subr.bf16.mxu1 %v1069_v7  ;;  %v400_v7 = vld [vmem:[%s1570_s2 + $0x210] sm:$0xff] }
  0x33   : > { %1114 = vmatprep.subr.bf16.mxu0 %v1113_v34  ;;  %v709_v34 = vld [vmem:[%s1572_s4 + $0x10] sm:$0xff] }
  0x35   : > { %1072 = vmatpush3.bf16.msra.mxu1 %v1071_v12  ;;  %v407_v12 = vld [vmem:[%s1570_s2 + $0x248] sm:$0xff] }
  0x36   : > { %1074 = vmatprep.subr.bf16.mxu1 %v1073_v13  ;;  %1116 = vmatpush3.bf16.msra.mxu0 %v1115_v46 }
  0x37   : > { %1117 = vmatprep.subr.bf16.mxu0 %v1183_v36 }
  0x39   : > { %1076 = vmatpush3.bf16.msra.mxu1 %v1075_v22  ;;  %v411_v22 = vld [vmem:[%s1570_s2 + $0x268] sm:$0xff] }
  0x3a   : > { %1078 = vmatprep.subr.bf16.mxu1 %v1077_v24  ;;  %v1136_v24 = vpack.c.bf16 %v411_v22, %v410_v21 }
  0x3d   : > { %1080 = vmatpush3.bf16.msra.mxu1 %v1079_v27  ;;  %v1139_v27 = vpack.c.bf16 %v413_v26, %v412_v25 }
  0x3e   : > { %1082 = vmatprep.subr.bf16.mxu1 %v1081_v42 }
  0x41   : > { %1084 = vmatpush3.bf16.msra.mxu1 %v1083_v47 }
  0x42   : > { %1141 = vmatprep.subr.bf16.mxu1 %v1183_v36 }
  0xad   : > { %v269_v28 = vpop.xlane.xlu0 %268 }
  0xae   : > { %v270_v29 = vrot.slane %v269_v28, 4 }
  0xb0   : > { %v271_v30 = vadd.f32 %v270_v29, %v269_v28 }
  0xb1   : > { %v287_v33 = vpop.xlane.xlu0 %286 }
  0xb2   : > { %v272_v40 = vrot.slane %v271_v30, 2  ;;  %v288_v41 = vrot.slane %v287_v33, 4 }
  0xb4   : > { %v289_v48 = vadd.f32 %v288_v41, %v287_v33  ;;  %v273_v49 = vadd.f32 %v272_v40, %v271_v30  ;;  %v708_v33 = vld [vmem:[%s1572_s4 + $0x8] sm:$0xff] }
  0xb5   : > { %v1142_v35 = vpack.c.bf16 %v708_v33, %v707_v32 }
  0xb6   : > { %v290_v50 = vrot.slane %v289_v48, 2  ;;  %v274_v51 = vrot.slane %v273_v49, 1 }
  0xb8   : > { %v291_v52 = vadd.f32 %v290_v50, %v289_v48  ;;  %v275_v53 = vadd.f32 %v274_v51, %v273_v49 }
  0xba   : > { %1152 = vpush %v275_v53  ;;  %v292_v54 = vrot.slane %v291_v52, 1 }
  0xbc   : > { %v293_v55 = vadd.f32 %v292_v54, %v291_v52  ;;  %v785_v52 = vlaneseq }
  0xbe   : > { %1154 = vpush %v293_v55  ;;  %v786_v53 = vand.u32 127, %v785_v52 }
  0xc0   : > { %v787_v54 = vcvt.s32.f32 %v786_v53 }
  0xeb   : > { %s1153_s9 = spop %1152 }
  0xec   : > { %s297_s10 = smul.f32 0.0001953125, %s1153_s9 }
  0xee   : > { %s301_s11 = smul.f32 %s297_s10, %s297_s10  ;;  %v303_v58 = vstv %s297_s10 }
  0xef   : > { %s1155_s12 = spop %1154  ;;  %v304_v61 = vsub.f32 %v1230_v14, %v303_v58  ;;  %v305_v62 = vsub.f32 %v1232_v16, %v303_v58  ;;  %v307_v63 = vsub.f32 %v1238_v19, %v303_v58  ;;  %v306_v1 = vsub.f32 %v1234_v17, %v303_v58  ;;  %v401_v14 = vld [vmem:[%s1570_s2 + $0x218] sm:$0xff]  ;;  %v402_v17 = vld [vmem:[%s1570_s2 + $0x220] sm:$0xff]  ;;  %v403_v19 = vld [vmem:[%s1570_s2 + $0x228] sm:$0xff] }
  0xf0   : > { %s300_s13 = smul.f32 0.0001953125, %s1155_s12  ;;  %v1121_v16 = vpack.c.bf16 %v401_v14, %v400_v7  ;;  %v1124_v8 = vpack.c.bf16 %v403_v19, %v402_v17  ;;  %v308_v28 = vsub.f32 %v1246_v23, %v303_v58  ;;  %v710_v23 = vld [vmem:[%s1572_s4 + $0x18] sm:$0xff] }
  0xf1   : > { %v1145_v37 = vpack.c.bf16 %v710_v23, %v709_v34 }
  0xf2   : > { %s302_s14 = ssub.f32 %s300_s13, %s301_s11  ;;  %s869_s11 = sshll.u32 %s1575_s19, 3 }
  0xf4   : > { %s309_s15 = sadd.f32 1e-05, %s302_s14  ;;  %s242_s14 = scalar_lea.vmem %s1573_s5, %s869_s11 }
  0xf6   : > { %v310_v56 = vstv %s309_s15 }
  0xf7   : > { %1171 = vrsqrt.f32 %v310_v56  ;;  %v492_v30 = vpop.f32.mrb[0].mxu1 }
  0xf8   : > { %v994_v31 = vpop.f32.mrb[1].mxu1 }
 0x101   : > { %v1172_v57 = vpop.eup %1171 }
 0x102   : > { %1156 = vpush %v1172_v57 }
 0x133   : > { %s1157_s22 = spop %1156 }
 0x134   : > { %v313_v0 = vstv %s1157_s22 }
 0x135   : > { %v314_v2 = vmul.f32 %v313_v0, %v304_v61  ;;  %v315_v3 = vmul.f32 %v313_v0, %v305_v62  ;;  %v317_v4 = vmul.f32 %v313_v0, %v307_v63  ;;  %v316_v6 = vmul.f32 %v313_v0, %v306_v1 }
 0x136   : > { %v318_v29 = vmul.f32 %v313_v0, %v308_v28 }
 0x137   : > { %560 = vmatprep.mubr.f32.mxu1 %v315_v3  ;;  %630 = vmatprep.mubr.f32.mxu0 %v317_v4 }
 0x138   : > { %561 = vmatmul.mubr.f32.vlgmr.msra.gmra.mrb[2].mxu1 %v314_v2  ;;  %631 = vmatmul.mubr.f32.vlgmr.msra.gmra.mrb[0].mxu0 %v316_v6 }
 0x139   : > { %1119 = vmatpush3.bf16.msra.mxu0 %v1118_v5  ;;  %1027 = vmatprep.mubr.msk.f32.mxu0 %vm1184_vm0, %v1185_v39 }
 0x13a   : > { %1120 = vmatprep.subr.bf16.mxu0 %v1183_v36  ;;  %1038 = vmatprep.mubr.msk.f32.mxu1 %vm1184_vm0, %v1185_v39  ;;  %v406_v39 = vld [vmem:[%s1570_s2 + $0x240] sm:$0xff] }
 0x13b   : > { %v1130_v13 = vpack.c.bf16 %v407_v12, %v406_v39  ;;  %1143 = vmatpush3.bf16.msra.mxu1 %v1142_v35 }
 0x13c   : > { %1144 = vmatprep.subr.bf16.mxu1 %v1183_v36 }
 0x13d   : > { %1122 = vmatpush3.bf16.msra.mxu0 %v1121_v16 }
 0x13e   : > { %1123 = vmatprep.subr.bf16.mxu0 %v1183_v36 }
 0x13f   : > { %1146 = vmatpush3.bf16.msra.mxu1 %v1145_v37 }
 0x141   : > { %1125 = vmatpush3.bf16.msra.mxu0 %v1124_v8 }
 0x142   : > { %1126 = vmatprep.subr.bf16.mxu0 %v1183_v36 }
 0x145   : > { %1128 = vmatpush3.bf16.msra.mxu0 %v1127_v11 }
 0x146   : > { %1129 = vmatprep.subr.bf16.mxu0 %v1183_v36 }
 0x149   : > { %1131 = vmatpush3.bf16.msra.mxu0 %v1130_v13 }
 0x14a   : > { %1132 = vmatprep.subr.bf16.mxu0 %v1183_v36 }
 0x14d   : > { %1134 = vmatpush3.bf16.msra.mxu0 %v1133_v20 }
 0x14e   : > { %1135 = vmatprep.subr.bf16.mxu0 %v1183_v36 }
 0x151   : > { %1137 = vmatpush3.bf16.msra.mxu0 %v1136_v24 }
 0x152   : > { %1138 = vmatprep.subr.bf16.mxu0 %v1183_v36 }
 0x155   : > { %1140 = vmatpush3.bf16.msra.mxu0 %v1139_v27 }
 0x158   : > { %1028 = vmatmul.mubr.f32.vlgmr.msra.gmra.mrb[2].mxu0 %v318_v29 }
 0x20b   : > { %v916_v38 = vpop.f32.mrb[2].mxu1  ;;  %v951_v40 = vpop.f32.mrb[0].mxu0 }
 0x20c   : > { %v917_v41 = vpop.f32.mrb[3].mxu1  ;;  %v952_v42 = vpop.f32.mrb[1].mxu0 }
 0x20d   : > { %v918_v43 = vadd.f32 %v917_v41, %v916_v38  ;;  %v953_v44 = vadd.f32 %v952_v42, %v951_v40 }
 0x20f   : > { %v563_v45 = vadd.f32 %v918_v43, %v492_v30 }
 0x211   : > { %v633_v46 = vadd.f32 %v953_v44, %v563_v45 }
 0x22b   : > { %v702_v47 = vpop.f32.mrb[2].mxu0 }
 0x22c   : > { %v703_v48 = vadd.f32 %v702_v47, %v633_v46  ;;  %v1029_v49 = vpop.f32.mrb[3].mxu0 }
 0x22e   : > { %1173 = vtanh.f32 %v703_v48 }
 0x238   : > { %v1174_v50 = vpop.eup %1173 }
 0x239   : > { %1039 = vmatmul.mubr.msk.f32.vlgmr.msra.gmra.mrb[4].mxu1 %vm711_vm2, %v1174_v50 }
 0x30c   : > { %v781_v51 = vpop.f32.mrb[4].mxu1 }
 0x30d   : > { %788 = vmax.xlane.f32.xlu1 %v781_v51  ;;  %v1040_v36 = vpop.f32.mrb[5].mxu1 }
 0x39a   : > { %v789_v55 = vpop.xlane.xlu1 %788 }
 0x39b   : > { %vm790_vm3 = vcmp.eq.f32.partialorder %v781_v51, %v789_v55 }
 0x39c   : > { %v791_v56 = vsel %vm790_vm3, %v787_v54, 128.0 }
 0x39d   : > { %792 = vmin.xlane.f32.xlu1 %v791_v56 }
 0x42a   : > { %v793_v57 = vpop.xlane.xlu1 %792 }
 0x42b   : > { %v1158_v58 = vtrunc.f32 %v793_v57 }
 0x42d   : > { %v1159_v59 = vcvt.f32.s32 %v1158_v58 }
 0x42f   : > { %796 = vst.msk [vmem:[%s242_s14] sm:$0xff] %vm795_vm4, %v1159_v59 }
 0x430 PF: > { %s15_s18 = sadd.s32 1, %s1181_s18  }
 0x431   : > { %p12_p4 = scmp.ge.s32.totalorder %s15_s18, 4  }
 0x433   :  { %14 = sbr.rel (!%p12_p4) target bundleno = 1 (0x1), region = 73 }

</bundles_post_ra>
